<compile_context>
chip_gen: v7x
topology: tpu7x:2x2x1
jax: 0.10.0
libtpu: 0.0.40
codegen_flags: <defaults>
</compile_context>

<pallas_src>
import functools

import jax
import jax.numpy as jnp
from jax.experimental import pallas as pl
from jax.experimental.pallas import tpu as pltpu

_MASK = -1e30      # large-negative mask; exp underflows to exactly 0 (no NaN risk)
_LN_EPS = 1e-5     # torch.nn.LayerNorm default
_VMEM_LIMIT = 32 * 1024 * 1024   # explicit scoped-VMEM budget (raises v5e's 16 MiB default)


def _round_up(v, m):
    return (v + m - 1) // m * m


# ---------------------------------------------------------------------------
# Stage 1: neighbour attention for ALL heads on batch element 0.
# grid = (num_query_row_tiles,). Per step: one lane-dense [TILE_Q, H*F(pad)]
# output slab; K/V ([N_pad, H*F(pad)] bf16) and the gate table stay resident.
# Q/K/V are pre-projected in the wrapper (no per-tile re-projection).
# ---------------------------------------------------------------------------
def _neighbour_attn_kernel(q_ref, k_ref, v_ref, adj_ref, ew_ref, o_ref, *,
                           n_heads, f_out, hf_pad, scale):
    adj = adj_ref[...].astype(jnp.float32)          # [TILE_Q, N_pad]
    not_edge = adj == 0.0
    q_all = q_ref[...]                              # [TILE_Q, HF_pad] bf16
    k_all = k_ref[...]                              # [N_pad, HF_pad] bf16 (resident)
    v_all = v_ref[...]                              # [N_pad, HF_pad] bf16 (resident)

    outs = []
    for h in range(n_heads):                        # static unrolled head loop
        lo = h * f_out
        q_h = q_all[:, lo:lo + f_out]
        k_h = k_all[:, lo:lo + f_out]
        v_h = v_all[:, lo:lo + f_out]
        # scores q @ k^T (bf16 MXU, f32 accumulate), no materialized transpose
        s = jax.lax.dot_general(q_h, k_h, (((1,), (1,)), ((), ())),
                                preferred_element_type=jnp.float32) * scale
        s = jnp.where(not_edge, _MASK, s)           # hide non-neighbours
        m = jnp.max(s, axis=-1, keepdims=True)
        e = jnp.exp(s - m)
        r = jnp.sum(e, axis=-1, keepdims=True)
        inv = pl.reciprocal(r, approx=True)         # EUP slot; gate folded in below
        g0 = ew_ref[h, 0]                           # softmax([w1, w2]) gates (SMEM)
        g1 = ew_ref[h, 1]
        wei = e * (g0 * inv) + g1 * adj             # blend attention with adjacency
        outs.append(jnp.dot(wei.astype(jnp.bfloat16), v_h,
                            preferred_element_type=jnp.float32))

    acc = jnp.concatenate(outs, axis=-1)            # [TILE_Q, H*F] (true width)
    hf = n_heads * f_out
    if hf_pad > hf:                                 # static pad to lane multiple
        acc = jnp.pad(acc, ((0, 0), (0, hf_pad - hf)))
    o_ref[...] = acc.astype(o_ref.dtype)


# ---------------------------------------------------------------------------
# Stage 2: output projection + LayerNorm over the N batch-0 rows (row-tiled).
# Padded feature columns are zero in weights/bias; variance uses E[(y-mu)^2]
# with a lane mask so padded columns never contaminate the statistics.
# ---------------------------------------------------------------------------
def _linear_ln_kernel(xc_ref, w_ref, b_ref, g_ref, beta_ref, o_ref, *, f_true, eps):
    y = jnp.dot(xc_ref[...], w_ref[...],
                preferred_element_type=jnp.float32) + b_ref[...]
    col = jax.lax.broadcasted_iota(jnp.int32, y.shape, 1)
    valid = col < f_true
    inv_f = 1.0 / f_true
    mu = jnp.sum(y, axis=-1, keepdims=True) * inv_f      # padded cols of y are 0
    d = jnp.where(valid, y - mu, 0.0)
    var = jnp.sum(d * d, axis=-1, keepdims=True) * inv_f
    o_ref[...] = (d * jax.lax.rsqrt(var + eps) * g_ref[...]
                  + beta_ref[...]).astype(o_ref.dtype)


@functools.partial(jax.jit, static_argnames=("tile_q",))
def multi_head_neighbour_attention(x, wq, wk, wv, w1s, w2s,
                                   lin_w, lin_b, ln_g, ln_b, adj,
                                   *, tile_q=256):
    """Forward of MultiHeadNeighbourAttention.

    x: [B, N, C] (C=h_size); wq/wk/wv: [H, F, C] (PyTorch layout, no bias);
    w1s/w2s: [H] per-head weighting scalars; lin_w: [F, H*F]; lin_b/ln_g/ln_b: [F];
    adj: [N, N] dense adjacency. Returns [B, N, F].
    """
    B, N, C = x.shape
    H, F, _ = wq.shape
    f32, bf16 = jnp.float32, jnp.bfloat16

    HF = H * F
    HF_pad = _round_up(HF, 128)              # heads packed at true F; pad only concat
    F_pad = _round_up(F, 128)
    TILE_Q = _round_up(min(tile_q, _round_up(N, 8)), 8)
    N_pad = _round_up(N, TILE_Q)
    n_q_tiles = N_pad // TILE_Q

    # ---- hoisted Q/K/V projections for all heads (tiny matmul, done once) ----
    def cat_heads(w):                        # [H, F, C] -> [C, H*F] (x @ W layout)
        return jnp.transpose(w.astype(f32), (2, 0, 1)).reshape(C, HF)

    w_qkv = jnp.concatenate([cat_heads(wq), cat_heads(wk), cat_heads(wv)], axis=1)
    qkv = jnp.dot(x[0].astype(f32), w_qkv, preferred_element_type=f32)   # [N, 3*H*F]
    q_all, k_all, v_all = jnp.split(qkv, 3, axis=1)

    def pad_nodes(a):                        # [N, HF] -> [N_pad, HF_pad] bf16
        return jnp.pad(a, ((0, N_pad - N), (0, HF_pad - HF))).astype(bf16)

    q_p, k_p, v_p = pad_nodes(q_all), pad_nodes(k_all), pad_nodes(v_all)
    adj_p = jnp.pad(adj.astype(bf16), ((0, N_pad - N), (0, N_pad - N)))

    # per-head softmax([weighting1, weighting2]) -> [H, 2] scalar table for SMEM
    ew = jax.nn.softmax(jnp.stack([w1s, w2s], axis=-1).astype(f32), axis=-1)

    stage1_bytes = 2 * (3 * N_pad * HF_pad + N_pad * N_pad + N_pad * HF_pad) + 4 * H * 2
    heads_cat = pl.pallas_call(
        functools.partial(_neighbour_attn_kernel, n_heads=H, f_out=F,
                          hf_pad=HF_pad, scale=float(F) ** -0.5),
        out_shape=jax.ShapeDtypeStruct((N_pad, HF_pad), bf16),
        grid_spec=pltpu.PrefetchScalarGridSpec(
            num_scalar_prefetch=0,
            grid=(n_q_tiles,),
            in_specs=[
                pl.BlockSpec((TILE_Q, HF_pad), lambda i: (i, 0)),   # Q rows (tiled)
                pl.BlockSpec((N_pad, HF_pad), lambda i: (0, 0)),    # K (resident)
                pl.BlockSpec((N_pad, HF_pad), lambda i: (0, 0)),    # V (resident)
                pl.BlockSpec((TILE_Q, N_pad), lambda i: (i, 0)),    # adj rows (streamed once)
                pl.BlockSpec(memory_space=pltpu.MemorySpace.SMEM),  # [H, 2] gate table
            ],
            out_specs=pl.BlockSpec((TILE_Q, HF_pad), lambda i: (i, 0)),
        ),
        compiler_params=pltpu.CompilerParams(
            dimension_semantics=("parallel",),
            vmem_limit_bytes=_VMEM_LIMIT),
        cost_estimate=pl.CostEstimate(
            flops=int(4 * H * N_pad * N_pad * F),
            transcendentals=int(H * N_pad * N_pad),
            bytes_accessed=int(stage1_bytes)),
    )(q_p, k_p, v_p, adj_p, ew)

    # ---- output projection + LayerNorm over batch-0 rows only ----
    w_out = jnp.pad(jnp.transpose(lin_w.astype(f32)),
                    ((0, HF_pad - HF), (0, F_pad - F))).astype(bf16)
    b_out = jnp.pad(lin_b.astype(f32), (0, F_pad - F)).reshape(1, F_pad)
    g_pad = jnp.pad(ln_g.astype(f32), (0, F_pad - F)).reshape(1, F_pad)
    beta_pad = jnp.pad(ln_b.astype(f32), (0, F_pad - F)).reshape(1, F_pad)

    out0 = pl.pallas_call(
        functools.partial(_linear_ln_kernel, f_true=F, eps=_LN_EPS),
        out_shape=jax.ShapeDtypeStruct((N_pad, F_pad), f32),
        grid_spec=pltpu.PrefetchScalarGridSpec(
            num_scalar_prefetch=0,
            grid=(n_q_tiles,),
            in_specs=[
                pl.BlockSpec((TILE_Q, HF_pad), lambda i: (i, 0)),   # activations (tiled)
                pl.BlockSpec((HF_pad, F_pad), lambda i: (0, 0)),    # W (resident)
                pl.BlockSpec((1, F_pad), lambda i: (0, 0)),         # bias
                pl.BlockSpec((1, F_pad), lambda i: (0, 0)),         # gamma
                pl.BlockSpec((1, F_pad), lambda i: (0, 0)),         # beta
            ],
            out_specs=pl.BlockSpec((TILE_Q, F_pad), lambda i: (i, 0)),
        ),
        compiler_params=pltpu.CompilerParams(
            dimension_semantics=("parallel",),
            vmem_limit_bytes=_VMEM_LIMIT),
        cost_estimate=pl.CostEstimate(
            flops=int(2 * N_pad * HF_pad * F_pad),
            transcendentals=int(N_pad),
            bytes_accessed=int(2 * N_pad * HF_pad + 2 * HF_pad * F_pad
                               + 4 * 3 * F_pad + 4 * N_pad * F_pad)),
    )(heads_cat, w_out, b_out, g_pad, beta_pad)

    out_b0 = out0[:N, :F]                                            # [N, F]

    # Batches >= 1 never received attention (the `break` in Head_Graph.forward):
    # their pre-LN activations are exactly lin_b -> one constant LayerNorm row.
    if B > 1:
        y0 = lin_b.astype(f32)
        mu0 = jnp.mean(y0)
        var0 = jnp.mean((y0 - mu0) ** 2)
        const_row = ((y0 - mu0) * jax.lax.rsqrt(var0 + _LN_EPS)
                     * ln_g.astype(f32) + ln_b.astype(f32))
        rest = jnp.broadcast_to(const_row, (B - 1, N, F))
        return jnp.concatenate([out_b0[None], rest], axis=0)
    return out_b0[None]


# ----------------------------- pure-JAX reference --------------------------
def _reference(x, wq, wk, wv, w1s, w2s, lin_w, lin_b, ln_g, ln_b, adj):
    B, N, C = x.shape
    H, F, _ = wq.shape
    x0 = x[0]
    heads = []
    for h in range(H):
        q = x0 @ wq[h].T
        k = x0 @ wk[h].T
        v = x0 @ wv[h].T
        s = (q @ k.T) * (F ** -0.5)
        s = jnp.where(adj == 0.0, -jnp.inf, s)
        p = jax.nn.softmax(s, axis=-1)
        g = jax.nn.softmax(jnp.array([w1s[h], w2s[h]]))
        wei = g[0] * p + g[1] * adj
        out0 = wei @ v
        heads.append(jnp.zeros((B, N, F), jnp.float32).at[0].set(out0))
    cat = jnp.concatenate(heads, axis=-1)
    y = cat @ lin_w.T + lin_b
    mu = jnp.mean(y, axis=-1, keepdims=True)
    var = jnp.mean((y - mu) ** 2, axis=-1, keepdims=True)
    return (y - mu) / jnp.sqrt(var + _LN_EPS) * ln_g + ln_b


if __name__ == "__main__":
    key = jax.random.PRNGKey(0)
    B, N, C = 2, 16, 32          # batch, graph nodes, h_size
    H, F = 4, 32                 # n_heads, f_out_size

    ks = jax.random.split(key, 9)
    x = jax.random.normal(ks[0], (B, N, C), jnp.float32)
    std_qkv = (2.0 / (C + F)) ** 0.5          # xavier-normal-ish
    wq = jax.random.normal(ks[1], (H, F, C), jnp.float32) * std_qkv
    wk = jax.random.normal(ks[2], (H, F, C), jnp.float32) * std_qkv
    wv = jax.random.normal(ks[3], (H, F, C), jnp.float32) * std_qkv
    w1s = jax.random.normal(ks[4], (H,), jnp.float32)
    w2s = jax.random.normal(ks[5], (H,), jnp.float32)
    std_lin = (2.0 / (F + H * F)) ** 0.5
    lin_w = jax.random.normal(ks[6], (F, H * F), jnp.float32) * std_lin
    lin_b = jax.random.normal(ks[7], (F,), jnp.float32) * 0.1
    ln_g = jnp.ones((F,), jnp.float32)
    ln_b = jnp.zeros((F,), jnp.float32)
    # random adjacency with self-loops so every node has >= 1 neighbour
    # (reference softmax over an all -inf row would be NaN; kernel falls back
    #  to a uniform distribution instead — documented divergence)
    adj = (jax.random.uniform(ks[8], (N, N)) < 0.3).astype(jnp.float32)
    adj = jnp.maximum(adj, jnp.eye(N, dtype=jnp.float32))

    out = multi_head_neighbour_attention(x, wq, wk, wv, w1s, w2s,
                                         lin_w, lin_b, ln_g, ln_b, adj)
    out = jax.block_until_ready(out)
    assert out.shape == (B, N, F)

    ref = _reference(x, wq, wk, wv, w1s, w2s, lin_w, lin_b, ln_g, ln_b, adj)
    max_err = float(jnp.max(jnp.abs(out - ref)))
    # bf16 MXU operands -> slightly looser tolerance than the all-f32 version
    assert jnp.allclose(out, ref, atol=5e-2, rtol=5e-2), max_err

    print("KERNEL_OK")
</pallas_src>

<mosaic_0001>
module attributes {stable_mosaic.version = 11 : i64} {
  func.func @_neighbour_attn_kernel(%arg0: i32, %arg1: memref<16x128xbf16, #tpu.memory_space<vmem>>, %arg2: memref<16x128xbf16, #tpu.memory_space<vmem>>, %arg3: memref<16x128xbf16, #tpu.memory_space<vmem>>, %arg4: memref<16x16xbf16, #tpu.memory_space<vmem>>, %arg5: memref<4x2xf32, #tpu.memory_space<smem>>, %arg6: memref<16x128xbf16, #tpu.memory_space<vmem>>) attributes {dimension_semantics = [#tpu.dimension_semantics<parallel>], iteration_bounds = array<i64: 1>, scalar_prefetch = 0 : i64, scratch_operands = 0 : i64, tpu.core_type = #tpu.core_type<tc>, window_params = [{transform_indices = @transform_0, window_bounds = array<i64: 16, 128>}, {pipeline_mode = #tpu.pipeline_mode<synchronous>, transform_indices = @transform_1, window_bounds = array<i64: 16, 128>}, {pipeline_mode = #tpu.pipeline_mode<synchronous>, transform_indices = @transform_2, window_bounds = array<i64: 16, 128>}, {transform_indices = @transform_3, window_bounds = array<i64: 16, 16>}, {transform_indices = @transform_4, window_bounds = array<i64: 4, 2>}, {transform_indices = @transform_5, window_bounds = array<i64: 16, 128>}]} {
    %c0 = arith.constant 0 : index
    %c0_0 = arith.constant 0 : index
    %0 = vector.load %arg4[%c0, %c0_0] : memref<16x16xbf16, #tpu.memory_space<vmem>>, vector<16x16xbf16>
    %1 = arith.extf %0 : vector<16x16xbf16> to vector<16x16xf32>
    %cst = arith.constant 0.000000e+00 : f32
    %2 = vector.broadcast %cst : f32 to vector<16x16xf32>
    %3 = arith.cmpf oeq, %1, %2 : vector<16x16xf32>
    %c0_1 = arith.constant 0 : index
    %c0_2 = arith.constant 0 : index
    %4 = vector.load %arg1[%c0_1, %c0_2] : memref<16x128xbf16, #tpu.memory_space<vmem>>, vector<16x128xbf16>
    %c0_3 = arith.constant 0 : index
    %c0_4 = arith.constant 0 : index
    %5 = vector.load %arg2[%c0_3, %c0_4] : memref<16x128xbf16, #tpu.memory_space<vmem>>, vector<16x128xbf16>
    %c0_5 = arith.constant 0 : index
    %c0_6 = arith.constant 0 : index
    %6 = vector.load %arg3[%c0_5, %c0_6] : memref<16x128xbf16, #tpu.memory_space<vmem>>, vector<16x128xbf16>
    %7 = vector.extract_strided_slice %4 {offsets = [0, 0], sizes = [16, 32], strides = [1, 1]} : vector<16x128xbf16> to vector<16x32xbf16>
    %8 = vector.extract_strided_slice %5 {offsets = [0, 0], sizes = [16, 32], strides = [1, 1]} : vector<16x128xbf16> to vector<16x32xbf16>
    %9 = vector.extract_strided_slice %6 {offsets = [0, 0], sizes = [16, 32], strides = [1, 1]} : vector<16x128xbf16> to vector<16x32xbf16>
    %cst_7 = arith.constant dense<0.000000e+00> : vector<16x16xf32>
    %10 = tpu.matmul %7, %8, %cst_7 {dimension_numbers = #tpu.dot_dimension_numbers<[1], [1], [0], [0], [0, 0, 1, 0], [], []>} : vector<16x32xbf16>, vector<16x32xbf16>, vector<16x16xf32> -> vector<16x16xf32>
    %cst_8 = arith.constant 0.176776692 : f32
    %11 = vector.broadcast %cst_8 : f32 to vector<16x16xf32>
    %12 = arith.mulf %10, %11 : vector<16x16xf32>
    %cst_9 = arith.constant -1.000000e+30 : f32
    %13 = vector.broadcast %cst_9 : f32 to vector<16x16xf32>
    %14 = arith.select %3, %13, %12 : vector<16x16xi1>, vector<16x16xf32>
    %cst_10 = arith.constant dense<0xFF800000> : vector<16xf32>
    %15 = vector.multi_reduction <maximumf>, %14, %cst_10 [1] : vector<16x16xf32> to vector<16xf32>
    %16 = vector.shape_cast %15 : vector<16xf32> to vector<16x1xf32>
    %17 = vector.broadcast %16 : vector<16x1xf32> to vector<16x16xf32>
    %18 = arith.subf %14, %17 : vector<16x16xf32>
    %19 = math.exp %18 : vector<16x16xf32>
    %cst_11 = arith.constant dense<0.000000e+00> : vector<16xf32>
    %20 = vector.multi_reduction <add>, %19, %cst_11 [1] : vector<16x16xf32> to vector<16xf32>
    %21 = vector.shape_cast %20 : vector<16xf32> to vector<16x1xf32>
    %22 = tpu.reciprocal %21 {approx = true} : vector<16x1xf32> -> vector<16x1xf32>
    %c0_12 = arith.constant 0 : index
    %c0_13 = arith.constant 0 : index
    %23 = memref.load %arg5[%c0_12, %c0_13] : memref<4x2xf32, #tpu.memory_space<smem>>
    %c0_14 = arith.constant 0 : index
    %c1 = arith.constant 1 : index
    %24 = memref.load %arg5[%c0_14, %c1] : memref<4x2xf32, #tpu.memory_space<smem>>
    %25 = vector.broadcast %23 : f32 to vector<16x1xf32>
    %26 = arith.mulf %25, %22 : vector<16x1xf32>
    %27 = vector.broadcast %26 : vector<16x1xf32> to vector<16x16xf32>
    %28 = arith.mulf %19, %27 : vector<16x16xf32>
    %29 = vector.broadcast %24 : f32 to vector<16x16xf32>
    %30 = arith.mulf %29, %1 : vector<16x16xf32>
    %31 = arith.addf %28, %30 : vector<16x16xf32>
    %32 = arith.truncf %31 : vector<16x16xf32> to vector<16x16xbf16>
    %cst_15 = arith.constant dense<0.000000e+00> : vector<16x32xf32>
    %33 = tpu.matmul %32, %9, %cst_15 {dimension_numbers = #tpu.dot_dimension_numbers<[1], [0], [0], [1], [0, 0, 1, 1], [], []>} : vector<16x16xbf16>, vector<16x32xbf16>, vector<16x32xf32> -> vector<16x32xf32>
    %34 = vector.extract_strided_slice %4 {offsets = [0, 32], sizes = [16, 32], strides = [1, 1]} : vector<16x128xbf16> to vector<16x32xbf16>
    %35 = vector.extract_strided_slice %5 {offsets = [0, 32], sizes = [16, 32], strides = [1, 1]} : vector<16x128xbf16> to vector<16x32xbf16>
    %36 = vector.extract_strided_slice %6 {offsets = [0, 32], sizes = [16, 32], strides = [1, 1]} : vector<16x128xbf16> to vector<16x32xbf16>
    %cst_16 = arith.constant dense<0.000000e+00> : vector<16x16xf32>
    %37 = tpu.matmul %34, %35, %cst_16 {dimension_numbers = #tpu.dot_dimension_numbers<[1], [1], [0], [0], [0, 0, 1, 0], [], []>} : vector<16x32xbf16>, vector<16x32xbf16>, vector<16x16xf32> -> vector<16x16xf32>
    %cst_17 = arith.constant 0.176776692 : f32
    %38 = vector.broadcast %cst_17 : f32 to vector<16x16xf32>
    %39 = arith.mulf %37, %38 : vector<16x16xf32>
    %cst_18 = arith.constant -1.000000e+30 : f32
    %40 = vector.broadcast %cst_18 : f32 to vector<16x16xf32>
    %41 = arith.select %3, %40, %39 : vector<16x16xi1>, vector<16x16xf32>
    %cst_19 = arith.constant dense<0xFF800000> : vector<16xf32>
    %42 = vector.multi_reduction <maximumf>, %41, %cst_19 [1] : vector<16x16xf32> to vector<16xf32>
    %43 = vector.shape_cast %42 : vector<16xf32> to vector<16x1xf32>
    %44 = vector.broadcast %43 : vector<16x1xf32> to vector<16x16xf32>
    %45 = arith.subf %41, %44 : vector<16x16xf32>
    %46 = math.exp %45 : vector<16x16xf32>
    %cst_20 = arith.constant dense<0.000000e+00> : vector<16xf32>
    %47 = vector.multi_reduction <add>, %46, %cst_20 [1] : vector<16x16xf32> to vector<16xf32>
    %48 = vector.shape_cast %47 : vector<16xf32> to vector<16x1xf32>
    %49 = tpu.reciprocal %48 {approx = true} : vector<16x1xf32> -> vector<16x1xf32>
    %c1_21 = arith.constant 1 : index
    %c0_22 = arith.constant 0 : index
    %50 = memref.load %arg5[%c1_21, %c0_22] : memref<4x2xf32, #tpu.memory_space<smem>>
    %c1_23 = arith.constant 1 : index
    %c1_24 = arith.constant 1 : index
    %51 = memref.load %arg5[%c1_23, %c1_24] : memref<4x2xf32, #tpu.memory_space<smem>>
    %52 = vector.broadcast %50 : f32 to vector<16x1xf32>
    %53 = arith.mulf %52, %49 : vector<16x1xf32>
    %54 = vector.broadcast %53 : vector<16x1xf32> to vector<16x16xf32>
    %55 = arith.mulf %46, %54 : vector<16x16xf32>
    %56 = vector.broadcast %51 : f32 to vector<16x16xf32>
    %57 = arith.mulf %56, %1 : vector<16x16xf32>
    %58 = arith.addf %55, %57 : vector<16x16xf32>
    %59 = arith.truncf %58 : vector<16x16xf32> to vector<16x16xbf16>
    %cst_25 = arith.constant dense<0.000000e+00> : vector<16x32xf32>
    %60 = tpu.matmul %59, %36, %cst_25 {dimension_numbers = #tpu.dot_dimension_numbers<[1], [0], [0], [1], [0, 0, 1, 1], [], []>} : vector<16x16xbf16>, vector<16x32xbf16>, vector<16x32xf32> -> vector<16x32xf32>
    %61 = vector.extract_strided_slice %4 {offsets = [0, 64], sizes = [16, 32], strides = [1, 1]} : vector<16x128xbf16> to vector<16x32xbf16>
    %62 = vector.extract_strided_slice %5 {offsets = [0, 64], sizes = [16, 32], strides = [1, 1]} : vector<16x128xbf16> to vector<16x32xbf16>
    %63 = vector.extract_strided_slice %6 {offsets = [0, 64], sizes = [16, 32], strides = [1, 1]} : vector<16x128xbf16> to vector<16x32xbf16>
    %cst_26 = arith.constant dense<0.000000e+00> : vector<16x16xf32>
    %64 = tpu.matmul %61, %62, %cst_26 {dimension_numbers = #tpu.dot_dimension_numbers<[1], [1], [0], [0], [0, 0, 1, 0], [], []>} : vector<16x32xbf16>, vector<16x32xbf16>, vector<16x16xf32> -> vector<16x16xf32>
    %cst_27 = arith.constant 0.176776692 : f32
    %65 = vector.broadcast %cst_27 : f32 to vector<16x16xf32>
    %66 = arith.mulf %64, %65 : vector<16x16xf32>
    %cst_28 = arith.constant -1.000000e+30 : f32
    %67 = vector.broadcast %cst_28 : f32 to vector<16x16xf32>
    %68 = arith.select %3, %67, %66 : vector<16x16xi1>, vector<16x16xf32>
    %cst_29 = arith.constant dense<0xFF800000> : vector<16xf32>
    %69 = vector.multi_reduction <maximumf>, %68, %cst_29 [1] : vector<16x16xf32> to vector<16xf32>
    %70 = vector.shape_cast %69 : vector<16xf32> to vector<16x1xf32>
    %71 = vector.broadcast %70 : vector<16x1xf32> to vector<16x16xf32>
    %72 = arith.subf %68, %71 : vector<16x16xf32>
    %73 = math.exp %72 : vector<16x16xf32>
    %cst_30 = arith.constant dense<0.000000e+00> : vector<16xf32>
    %74 = vector.multi_reduction <add>, %73, %cst_30 [1] : vector<16x16xf32> to vector<16xf32>
    %75 = vector.shape_cast %74 : vector<16xf32> to vector<16x1xf32>
    %76 = tpu.reciprocal %75 {approx = true} : vector<16x1xf32> -> vector<16x1xf32>
    %c2 = arith.constant 2 : index
    %c0_31 = arith.constant 0 : index
    %77 = memref.load %arg5[%c2, %c0_31] : memref<4x2xf32, #tpu.memory_space<smem>>
    %c2_32 = arith.constant 2 : index
    %c1_33 = arith.constant 1 : index
    %78 = memref.load %arg5[%c2_32, %c1_33] : memref<4x2xf32, #tpu.memory_space<smem>>
    %79 = vector.broadcast %77 : f32 to vector<16x1xf32>
    %80 = arith.mulf %79, %76 : vector<16x1xf32>
    %81 = vector.broadcast %80 : vector<16x1xf32> to vector<16x16xf32>
    %82 = arith.mulf %73, %81 : vector<16x16xf32>
    %83 = vector.broadcast %78 : f32 to vector<16x16xf32>
    %84 = arith.mulf %83, %1 : vector<16x16xf32>
    %85 = arith.addf %82, %84 : vector<16x16xf32>
    %86 = arith.truncf %85 : vector<16x16xf32> to vector<16x16xbf16>
    %cst_34 = arith.constant dense<0.000000e+00> : vector<16x32xf32>
    %87 = tpu.matmul %86, %63, %cst_34 {dimension_numbers = #tpu.dot_dimension_numbers<[1], [0], [0], [1], [0, 0, 1, 1], [], []>} : vector<16x16xbf16>, vector<16x32xbf16>, vector<16x32xf32> -> vector<16x32xf32>
    %88 = vector.extract_strided_slice %4 {offsets = [0, 96], sizes = [16, 32], strides = [1, 1]} : vector<16x128xbf16> to vector<16x32xbf16>
    %89 = vector.extract_strided_slice %5 {offsets = [0, 96], sizes = [16, 32], strides = [1, 1]} : vector<16x128xbf16> to vector<16x32xbf16>
    %90 = vector.extract_strided_slice %6 {offsets = [0, 96], sizes = [16, 32], strides = [1, 1]} : vector<16x128xbf16> to vector<16x32xbf16>
    %cst_35 = arith.constant dense<0.000000e+00> : vector<16x16xf32>
    %91 = tpu.matmul %88, %89, %cst_35 {dimension_numbers = #tpu.dot_dimension_numbers<[1], [1], [0], [0], [0, 0, 1, 0], [], []>} : vector<16x32xbf16>, vector<16x32xbf16>, vector<16x16xf32> -> vector<16x16xf32>
    %cst_36 = arith.constant 0.176776692 : f32
    %92 = vector.broadcast %cst_36 : f32 to vector<16x16xf32>
    %93 = arith.mulf %91, %92 : vector<16x16xf32>
    %cst_37 = arith.constant -1.000000e+30 : f32
    %94 = vector.broadcast %cst_37 : f32 to vector<16x16xf32>
    %95 = arith.select %3, %94, %93 : vector<16x16xi1>, vector<16x16xf32>
    %cst_38 = arith.constant dense<0xFF800000> : vector<16xf32>
    %96 = vector.multi_reduction <maximumf>, %95, %cst_38 [1] : vector<16x16xf32> to vector<16xf32>
    %97 = vector.shape_cast %96 : vector<16xf32> to vector<16x1xf32>
    %98 = vector.broadcast %97 : vector<16x1xf32> to vector<16x16xf32>
    %99 = arith.subf %95, %98 : vector<16x16xf32>
    %100 = math.exp %99 : vector<16x16xf32>
    %cst_39 = arith.constant dense<0.000000e+00> : vector<16xf32>
    %101 = vector.multi_reduction <add>, %100, %cst_39 [1] : vector<16x16xf32> to vector<16xf32>
    %102 = vector.shape_cast %101 : vector<16xf32> to vector<16x1xf32>
    %103 = tpu.reciprocal %102 {approx = true} : vector<16x1xf32> -> vector<16x1xf32>
    %c3 = arith.constant 3 : index
    %c0_40 = arith.constant 0 : index
    %104 = memref.load %arg5[%c3, %c0_40] : memref<4x2xf32, #tpu.memory_space<smem>>
    %c3_41 = arith.constant 3 : index
    %c1_42 = arith.constant 1 : index
    %105 = memref.load %arg5[%c3_41, %c1_42] : memref<4x2xf32, #tpu.memory_space<smem>>
    %106 = vector.broadcast %104 : f32 to vector<16x1xf32>
    %107 = arith.mulf %106, %103 : vector<16x1xf32>
    %108 = vector.broadcast %107 : vector<16x1xf32> to vector<16x16xf32>
    %109 = arith.mulf %100, %108 : vector<16x16xf32>
    %110 = vector.broadcast %105 : f32 to vector<16x16xf32>
    %111 = arith.mulf %110, %1 : vector<16x16xf32>
    %112 = arith.addf %109, %111 : vector<16x16xf32>
    %113 = arith.truncf %112 : vector<16x16xf32> to vector<16x16xbf16>
    %cst_43 = arith.constant dense<0.000000e+00> : vector<16x32xf32>
    %114 = tpu.matmul %113, %90, %cst_43 {dimension_numbers = #tpu.dot_dimension_numbers<[1], [0], [0], [1], [0, 0, 1, 1], [], []>} : vector<16x16xbf16>, vector<16x32xbf16>, vector<16x32xf32> -> vector<16x32xf32>
    %115 = tpu.concatenate %33, %60, %87, %114 in 1 : vector<16x32xf32>, vector<16x32xf32>, vector<16x32xf32>, vector<16x32xf32> -> vector<16x128xf32>
    %116 = arith.truncf %115 : vector<16x128xf32> to vector<16x128xbf16>
    %c0_44 = arith.constant 0 : index
    %c0_45 = arith.constant 0 : index
    %117 = vector.load %arg6[%c0_44, %c0_45] : memref<16x128xbf16, #tpu.memory_space<vmem>>, vector<16x128xbf16>
    tpu.vector_store %arg6[%c0_44, %c0_45], %116 {strides = array<i32>} : memref<16x128xbf16, #tpu.memory_space<vmem>>, vector<16x128xbf16>,
    return
  }
  func.func @transform_0(%arg0: i32) -> (i32, i32) {
    %c0_i32 = arith.constant 0 : i32
    %c0_i32_0 = arith.constant 0 : i32
    return %arg0, %c0_i32 : i32, i32
  }
  func.func @transform_1(%arg0: i32) -> (i32, i32) {
    %c0_i32 = arith.constant 0 : i32
    %c0_i32_0 = arith.constant 0 : i32
    %c0_i32_1 = arith.constant 0 : i32
    return %c0_i32, %c0_i32_0 : i32, i32
  }
  func.func @transform_2(%arg0: i32) -> (i32, i32) {
    %c0_i32 = arith.constant 0 : i32
    %c0_i32_0 = arith.constant 0 : i32
    %c0_i32_1 = arith.constant 0 : i32
    return %c0_i32, %c0_i32_0 : i32, i32
  }
  func.func @transform_3(%arg0: i32) -> (i32, i32) {
    %c0_i32 = arith.constant 0 : i32
    %c0_i32_0 = arith.constant 0 : i32
    return %arg0, %c0_i32 : i32, i32
  }
  func.func @transform_4(%arg0: i32) -> (i32, i32) {
    %c0_i32 = arith.constant 0 : i32
    %c0_i32_0 = arith.constant 0 : i32
    %c0_i32_1 = arith.constant 0 : i32
    return %c0_i32, %c0_i32_0 : i32, i32
  }
  func.func @transform_5(%arg0: i32) -> (i32, i32) {
    %c0_i32 = arith.constant 0 : i32
    %c0_i32_0 = arith.constant 0 : i32
    return %arg0, %c0_i32 : i32, i32
  }
}

module attributes {stable_mosaic.version = 11 : i64} {
  func.func @_linear_ln_kernel(%arg0: i32, %arg1: memref<16x128xbf16, #tpu.memory_space<vmem>>, %arg2: memref<128x128xbf16, #tpu.memory_space<vmem>>, %arg3: memref<1x128xf32, #tpu.memory_space<vmem>>, %arg4: memref<1x128xf32, #tpu.memory_space<vmem>>, %arg5: memref<1x128xf32, #tpu.memory_space<vmem>>, %arg6: memref<16x128xf32, #tpu.memory_space<vmem>>) attributes {dimension_semantics = [#tpu.dimension_semantics<parallel>], iteration_bounds = array<i64: 1>, scalar_prefetch = 0 : i64, scratch_operands = 0 : i64, tpu.core_type = #tpu.core_type<tc>, window_params = [{transform_indices = @transform_0, window_bounds = array<i64: 16, 128>}, {pipeline_mode = #tpu.pipeline_mode<synchronous>, transform_indices = @transform_1, window_bounds = array<i64: 128, 128>}, {pipeline_mode = #tpu.pipeline_mode<synchronous>, transform_indices = @transform_2, window_bounds = array<i64: 1, 128>}, {pipeline_mode = #tpu.pipeline_mode<synchronous>, transform_indices = @transform_3, window_bounds = array<i64: 1, 128>}, {pipeline_mode = #tpu.pipeline_mode<synchronous>, transform_indices = @transform_4, window_bounds = array<i64: 1, 128>}, {transform_indices = @transform_5, window_bounds = array<i64: 16, 128>}]} {
    %c0 = arith.constant 0 : index
    %c0_0 = arith.constant 0 : index
    %0 = vector.load %arg1[%c0, %c0_0] : memref<16x128xbf16, #tpu.memory_space<vmem>>, vector<16x128xbf16>
    %c0_1 = arith.constant 0 : index
    %c0_2 = arith.constant 0 : index
    %1 = vector.load %arg2[%c0_1, %c0_2] : memref<128x128xbf16, #tpu.memory_space<vmem>>, vector<128x128xbf16>
    %cst = arith.constant dense<0.000000e+00> : vector<16x128xf32>
    %2 = tpu.matmul %0, %1, %cst {dimension_numbers = #tpu.dot_dimension_numbers<[1], [0], [0], [1], [0, 0, 1, 1], [], []>} : vector<16x128xbf16>, vector<128x128xbf16>, vector<16x128xf32> -> vector<16x128xf32>
    %c0_3 = arith.constant 0 : index
    %c0_4 = arith.constant 0 : index
    %3 = vector.load %arg3[%c0_3, %c0_4] : memref<1x128xf32, #tpu.memory_space<vmem>>, vector<1x128xf32>
    %4 = vector.broadcast %3 : vector<1x128xf32> to vector<16x128xf32>
    %5 = arith.addf %2, %4 : vector<16x128xf32>
    %6 = tpu.iota {dimensions = array<i32: 1>} : vector<16x128xi32>
    %c32_i32 = arith.constant 32 : i32
    %7 = vector.broadcast %c32_i32 : i32 to vector<16x128xi32>
    %8 = arith.cmpi slt, %6, %7 : vector<16x128xi32>
    %cst_5 = arith.constant dense<0.000000e+00> : vector<16xf32>
    %9 = vector.multi_reduction <add>, %5, %cst_5 [1] : vector<16x128xf32> to vector<16xf32>
    %10 = vector.shape_cast %9 : vector<16xf32> to vector<16x1xf32>
    %cst_6 = arith.constant 3.125000e-02 : f32
    %11 = vector.broadcast %cst_6 : f32 to vector<16x1xf32>
    %12 = arith.mulf %10, %11 : vector<16x1xf32>
    %13 = vector.broadcast %12 : vector<16x1xf32> to vector<16x128xf32>
    %14 = arith.subf %5, %13 : vector<16x128xf32>
    %cst_7 = arith.constant 0.000000e+00 : f32
    %15 = vector.broadcast %cst_7 : f32 to vector<16x128xf32>
    %16 = arith.select %8, %14, %15 : vector<16x128xi1>, vector<16x128xf32>
    %17 = arith.mulf %16, %16 : vector<16x128xf32>
    %cst_8 = arith.constant dense<0.000000e+00> : vector<16xf32>
    %18 = vector.multi_reduction <add>, %17, %cst_8 [1] : vector<16x128xf32> to vector<16xf32>
    %19 = vector.shape_cast %18 : vector<16xf32> to vector<16x1xf32>
    %cst_9 = arith.constant 3.125000e-02 : f32
    %20 = vector.broadcast %cst_9 : f32 to vector<16x1xf32>
    %21 = arith.mulf %19, %20 : vector<16x1xf32>
    %cst_10 = arith.constant 9.99999974E-6 : f32
    %22 = vector.broadcast %cst_10 : f32 to vector<16x1xf32>
    %23 = arith.addf %21, %22 : vector<16x1xf32>
    %24 = math.rsqrt %23 : vector<16x1xf32>
    %25 = vector.broadcast %24 : vector<16x1xf32> to vector<16x128xf32>
    %26 = arith.mulf %16, %25 : vector<16x128xf32>
    %c0_11 = arith.constant 0 : index
    %c0_12 = arith.constant 0 : index
    %27 = vector.load %arg4[%c0_11, %c0_12] : memref<1x128xf32, #tpu.memory_space<vmem>>, vector<1x128xf32>
    %28 = vector.broadcast %27 : vector<1x128xf32> to vector<16x128xf32>
    %29 = arith.mulf %26, %28 : vector<16x128xf32>
    %c0_13 = arith.constant 0 : index
    %c0_14 = arith.constant 0 : index
    %30 = vector.load %arg5[%c0_13, %c0_14] : memref<1x128xf32, #tpu.memory_space<vmem>>, vector<1x128xf32>
    %31 = vector.broadcast %30 : vector<1x128xf32> to vector<16x128xf32>
    %32 = arith.addf %29, %31 : vector<16x128xf32>
    %c0_15 = arith.constant 0 : index
    %c0_16 = arith.constant 0 : index
    %33 = vector.load %arg6[%c0_15, %c0_16] : memref<16x128xf32, #tpu.memory_space<vmem>>, vector<16x128xf32>
    tpu.vector_store %arg6[%c0_15, %c0_16], %32 {strides = array<i32>} : memref<16x128xf32, #tpu.memory_space<vmem>>, vector<16x128xf32>,
    return
  }
  func.func @transform_0(%arg0: i32) -> (i32, i32) {
    %c0_i32 = arith.constant 0 : i32
    %c0_i32_0 = arith.constant 0 : i32
    return %arg0, %c0_i32 : i32, i32
  }
  func.func @transform_1(%arg0: i32) -> (i32, i32) {
    %c0_i32 = arith.constant 0 : i32
    %c0_i32_0 = arith.constant 0 : i32
    %c0_i32_1 = arith.constant 0 : i32
    return %c0_i32, %c0_i32_0 : i32, i32
  }
  func.func @transform_2(%arg0: i32) -> (i32, i32) {
    %c0_i32 = arith.constant 0 : i32
    %c0_i32_0 = arith.constant 0 : i32
    %c0_i32_1 = arith.constant 0 : i32
    return %c0_i32, %c0_i32_0 : i32, i32
  }
  func.func @transform_3(%arg0: i32) -> (i32, i32) {
    %c0_i32 = arith.constant 0 : i32
    %c0_i32_0 = arith.constant 0 : i32
    %c0_i32_1 = arith.constant 0 : i32
    return %c0_i32, %c0_i32_0 : i32, i32
  }
  func.func @transform_4(%arg0: i32) -> (i32, i32) {
    %c0_i32 = arith.constant 0 : i32
    %c0_i32_0 = arith.constant 0 : i32
    %c0_i32_1 = arith.constant 0 : i32
    return %c0_i32, %c0_i32_0 : i32, i32
  }
  func.func @transform_5(%arg0: i32) -> (i32, i32) {
    %c0_i32 = arith.constant 0 : i32
    %c0_i32_0 = arith.constant 0 : i32
    return %arg0, %c0_i32 : i32, i32
  }
}

</mosaic_0001>

<bundles_post_ra>
// kernel: multi_head_neighbour_attention.3
= control target key start
LH: loop header
LB: loop body
LE: loop exit
PB: predicated region body
PF: predicated region fallthrough
CT: control target
= control target key end

     0   :  { %v248_v0 = vmov 0.0   ;;  %vm249_vm0 = vmmov 0   ;;  %v141_v17 = vlaneseq  ;;  %s322_s1 = inlined_call_operand.vmem [shape: bf16[128,128], index: 1, kind: input, shape index: {}]   ;;  %s323_s0 = inlined_call_operand.vmem [shape: bf16[16,128], index: 0, kind: input, shape index: {}]   ;;  %s324_s2 = inlined_call_operand.vmem [shape: f32[1,128], index: 2, kind: input, shape index: {}]   ;;  %s325_s3 = inlined_call_operand.vmem [shape: f32[1,128], index: 3, kind: input, shape index: {}]   ;;  %s326_s4 = inlined_call_operand.vmem [shape: f32[1,128], index: 4, kind: input, shape index: {}]   ;;  %s327_s5 = inlined_call_operand.vmem [shape: f32[16,128], index: 5, kind: output, shape index: {}]  }
   0x1   :  { %213 = vmatprep.subr.bf16.mxu0 %v248_v0  ;;  %v235_v1 = vld [vmem:[%s322_s1] sm:$0xff]   ;;  %229 = vmatprep.mubr.msk.bf16.mxu0 %vm249_vm0, %v248_v0  ;;  %v236_v2 = vld [vmem:[%s322_s1 + $0x8] sm:$0xff]   ;;  %v237_v3 = vld [vmem:[%s322_s1 + $0x10] sm:$0xff]  }
   0x2   :  { %214 = vmatpush3.bf16.msra.mxu0 %v235_v1  ;;  %v238_v4 = vld [vmem:[%s322_s1 + $0x18] sm:$0xff]   ;;  %v239_v5 = vld [vmem:[%s322_s1 + $0x20] sm:$0xff]   ;;  %v240_v6 = vld [vmem:[%s322_s1 + $0x28] sm:$0xff]   ;;  %v142_v18 = vand.u32 127, %v141_v17 }
   0x3   :  { %215 = vmatprep.subr.bf16.mxu0 %v248_v0  ;;  %v241_v7 = vld [vmem:[%s322_s1 + $0x30] sm:$0xff]   ;;  %v242_v8 = vld [vmem:[%s322_s1 + $0x38] sm:$0xff]   ;;  %v243_v9 = vld [vmem:[%s323_s0] sm:$0xff]  }
   0x4   :  { %v192_v10 = vld [vmem:[%s324_s2] ss:$0 sm:$0xff]  ;;  %vm143_vm1 = vcmp.lt.s32.totalorder %v142_v18, 32 }
   0x5   :  { %v202_v36 = vld [vmem:[%s325_s3] ss:$0 sm:$0xff] }
   0x6   :  { %216 = vmatpush3.bf16.msra.mxu0 %v236_v2  ;;  %v203_v38 = vld [vmem:[%s326_s4] ss:$0 sm:$0xff] }
   0x7   :  { %217 = vmatprep.subr.bf16.mxu0 %v248_v0 }
   0xa   :  { %218 = vmatpush3.bf16.msra.mxu0 %v237_v3 }
   0xb   :  { %219 = vmatprep.subr.bf16.mxu0 %v248_v0 }
   0xe   :  { %220 = vmatpush3.bf16.msra.mxu0 %v238_v4 }
   0xf   :  { %221 = vmatprep.subr.bf16.mxu0 %v248_v0 }
  0x12   :  { %222 = vmatpush3.bf16.msra.mxu0 %v239_v5 }
  0x13   :  { %223 = vmatprep.subr.bf16.mxu0 %v248_v0 }
  0x16   :  { %224 = vmatpush3.bf16.msra.mxu0 %v240_v6 }
  0x17   :  { %225 = vmatprep.subr.bf16.mxu0 %v248_v0 }
  0x1a   :  { %226 = vmatpush3.bf16.msra.mxu0 %v241_v7 }
  0x1b   :  { %227 = vmatprep.subr.bf16.mxu0 %v248_v0 }
  0x1e   :  { %228 = vmatpush3.bf16.msra.mxu0 %v242_v8 }
  0x21   :  { %230 = vmatmul.mubr.bf16.vlgmr.msra.gmra.mrb[0].mxu0 %v243_v9 }
  0xf4   :  { %v134_v11 = vpop.f32.mrb[0].mxu0 }
  0xf5   :  { %v135_v12 = vadd.f32 %v192_v10, %v134_v11  ;;  %v231_v13 = vpop.f32.mrb[1].mxu0 }
  0xf6   :  { %v137_v14 = vpop.f32.mrb[2].mxu0 }
  0xf7   :  { %144 = vadd.xlane.f32.xlu0 %v135_v12  ;;  %v232_v15 = vpop.f32.mrb[3].mxu0  ;;  %v138_v16 = vadd.f32 %v192_v10, %v137_v14 }
  0xfb   :  { %146 = vadd.xlane.f32.xlu0 %v138_v16 }
 0x184   :  { %v145_v19 = vpop.xlane.xlu0 %144 }
 0x185   :  { %v148_v20 = vmul.f32 0.03125, %v145_v19 }
 0x187   :  { %v150_v21 = vsub.f32 %v135_v12, %v148_v20 }
 0x188   :  { %v147_v22 = vpop.xlane.xlu0 %146 }
 0x189   :  { %v149_v23 = vmul.f32 0.03125, %v147_v22  ;;  %v152_v24 = vsel %vm143_vm1, %v150_v21, 0.0 }
 0x18a   :  { %v154_v25 = vmul.f32 %v152_v24, %v152_v24 }
 0x18b   :  { %v151_v26 = vsub.f32 %v138_v16, %v149_v23 }
 0x18c   :  { %156 = vadd.xlane.f32.xlu1 %v154_v25 }
 0x18d   :  { %v153_v27 = vsel %vm143_vm1, %v151_v26, 0.0 }
 0x18e   :  { %v155_v28 = vmul.f32 %v153_v27, %v153_v27 }
 0x190   :  { %158 = vadd.xlane.f32.xlu1 %v155_v28 }
 0x219   :  { %v157_v29 = vpop.xlane.xlu1 %156 }
 0x21a   :  { %v160_v30 = vmul.f32 0.03125, %v157_v29 }
 0x21c   :  { %v162_v31 = vadd.f32 1e-05, %v160_v30 }
 0x21d   :  { %v159_v32 = vpop.xlane.xlu1 %158 }
 0x21e   :  { %244 = vrsqrt.f32 %v162_v31  ;;  %v161_v33 = vmul.f32 0.03125, %v159_v32 }
 0x220   :  { %v163_v34 = vadd.f32 1e-05, %v161_v33 }
 0x222   :  { %246 = vrsqrt.f32 %v163_v34 }
 0x228   :  { %v245_v35 = vpop.eup %244 }
 0x229   :  { %v166_v37 = vmul.f32 %v245_v35, %v152_v24 }
 0x22b   :  { %v175_v39 = vmul.f32 %v202_v36, %v166_v37 }
 0x22c   :  { %v247_v40 = vpop.eup %246 }
 0x22d   :  { %v184_v41 = vadd.f32 %v203_v38, %v175_v39  ;;  %v167_v42 = vmul.f32 %v247_v40, %v153_v27 }
 0x22f   :  { %186 = vst [vmem:[%s327_s5] sm:$0xff] %v184_v41  ;;  %v176_v43 = vmul.f32 %v202_v36, %v167_v42 }
 0x231   :  { %v185_v44 = vadd.f32 %v203_v38, %v176_v43 }
 0x233   :  { %187 = vst [vmem:[%s327_s5 + $0x8] sm:$0xff] %v185_v44 }

// kernel: multi_head_neighbour_attention.2
= control target key start
LH: loop header
LB: loop body
LE: loop exit
PB: predicated region body
PF: predicated region fallthrough
CT: control target
= control target key end

     0   :  { %10 = vsyncpa [#allocation3], 0  ;;  %s979_s0 = inlined_call_operand.vmem [shape: bf16[16,128], index: 0, kind: input, shape index: {}]   ;;  %s980_s1 = inlined_call_operand.vmem [shape: bf16[16,128], index: 1, kind: input, shape index: {}]   ;;  %s981_s2 = inlined_call_operand.vmem [shape: bf16[16,128], index: 2, kind: input, shape index: {}]   ;;  %s982_s3 = inlined_call_operand.vmem [shape: bf16[16,16], index: 3, kind: input, shape index: {}]   ;;  %s983_s4 = inlined_call_operand.vmem [shape: f32[4,2], index: 4, kind: input, shape index: {}]   ;;  %s984_s5 = inlined_call_operand.vmem [shape: bf16[16,128], index: 5, kind: output, shape index: {}]  }
   0x1   :  { %s25_s20 = sshll.u32 %s983_s4, 4  ;;  %s26_s20 = int_to_ptr.vmem [resolvable:$true] %s25_s20 }
   0x2   :  { %s795_s21 = scalar_lea.vmem %s26_s20, 64  ;;  %p800_p1 = scmp.lt.s32.totalorder %s26_s20, %s26_s20 }
   0x3   :  { %p796_p0 = scmp.ne.s32.totalorder %s26_s20, %s795_s21  ;;  %p801_p2 = scmp.lt.s32.totalorder %s795_s21, %s795_s21 }
   0x5   :  { %p802_p3 = por %p801_p2, %p800_p1 }
   0x7   :  { %p803_p4 = pnand %p802_p3, %p796_p0 }
   0x9   :  { %806 = shalt.err (!%p803_p4)
}
   0xa   :  { %s809_s22 = smov [#allocation2]  }
   0xb   :  { %28 = dma.vmem_to_smem %s26_s20, 64, %s809_s22, [#allocation3]  }
   0xc   :  { %807 = dma.done.wait [#allocation3], 64  }
   0xd   :  { %808 = vsyncadd [#allocation3], 4294967232 }
   0xe   :  { %32 = sfence }
   0xf   :  { %v760_v0 = vld [vmem:[%s980_s1] sm:$0xff]   ;;  %v810_v1 = vmov 0.0   ;;  %vm56_vm0 = vcmask 261120   ;;  %vm811_vm1 = vmmov 0   ;;  %vm108_vm3 = vcmask 130048   ;;  %s814_s27 = smov 64  }
  0x10   :  { %691 = vmatprep.subr.bf16.mxu0 %v810_v1  ;;  %697 = vmatprep.subr.bf16.mxu1 %v810_v1  ;;  %v61_v2 = vsel %vm56_vm0, %v760_v0, 0  ;;  %v761_v3 = vld [vmem:[%s979_s0] sm:$0xff]   ;;  %s812_s0 = smov 96   ;;  %s129_s30 = sld [smem:[#allocation2]]  ;;  %vm623_vm5 = vcmask 523264   ;;  %vm626_vm6 = vcmask 785408  }
  0x11   :  { %693 = vmatprep.mubr.msk.bf16.mxu0 %vm811_vm1, %v810_v1  ;;  %699 = vmatprep.mubr.msk.bf16.mxu1 %vm811_vm1, %v810_v1  ;;  %v667_v4 = vld [vmem:[%s982_s3] sm:$0xff]   ;;  %s813_s3 = smov 32   ;;  %s647_s6 = sld [smem:[#allocation2 + $0x1]] }
  0x12   :  { %692 = vmatpush3.bf16.xpose.msra.mxu0 %v61_v2  ;;  %v868_v5 = vunpack.c.l.bf16 %v667_v4  ;;  %v870_v6 = vunpack.c.h.bf16 %v667_v4  ;;  %v889_v27 = vld [vmem:[%s981_s2] sm:$0xff]   ;;  %s651_s2 = sld [smem:[#allocation2 + $0x80]]  ;;  %s652_s7 = sld [smem:[#allocation2 + $0x81]] }
  0x13   :  { %709 = vmatprep.subr.bf16.mxu0 %v810_v1  ;;  %698 = vmatpush3.bf16.msra.mxu1 %v889_v27  ;;  %s655_s8 = sld [smem:[#allocation2 + $0x100]]  ;;  %s656_s9 = sld [smem:[#allocation2 + $0x101]] }
  0x14   :  { %vm38_vm2 = vcmp.eq.f32.partialorder %v868_v5, 0.0  ;;  %vm39_vm4 = vcmp.eq.f32.partialorder %v870_v6, 0.0  ;;  %703 = vmatprep.subr.bf16.mxu1 %v810_v1  ;;  %s659_s10 = sld [smem:[#allocation2 + $0x180]]  ;;  %s660_s11 = sld [smem:[#allocation2 + $0x181]] }
  0x16   :  { %v131_v30 = vstv %s129_s30 }
  0x17   :  { %v136_v33 = vstv %s647_s6 }
  0x18   :  { %v137_v37 = vmul.f32 %v868_v5, %v136_v33  ;;  %v138_v38 = vmul.f32 %v870_v6, %v136_v33 }
  0x19   :  { %694 = vmatmul.mubr.msk.bf16.vlgmr.msra.gmra.mrb[0].mxu0 %vm56_vm0, %v761_v3 }
  0x1a   :  { %711 = vmatprep.mubr.msk.bf16.mxu0 %vm811_vm1, %v810_v1 }
  0xec   :  { %v97_v7 = vpop.f32.mrb[0].mxu0 }
  0xed   :  { %v104_v8 = vmul.f32 0.17677669, %v97_v7  ;;  %v695_v9 = vpop.f32.mrb[1].mxu0 }
  0xee   :  { %v100_v10 = vpop.f32.mrb[2].mxu0 }
  0xef   :  { %v105_v11 = vmul.f32 0.17677669, %v100_v10  ;;  %v696_v12 = vpop.f32.mrb[3].mxu0  ;;  %v106_v13 = vsel %vm38_vm2, -1e+30, %v104_v8 }
  0xf0   :  { %v109_v14 = vsel %vm108_vm3, %v106_v13, -inf }
  0xf1   :  { %110 = vmax.xlane.f32.xlu0 %v109_v14  ;;  %v107_v15 = vsel %vm39_vm4, -1e+30, %v105_v11 }
  0xf2   :  { %v112_v16 = vsel %vm108_vm3, %v107_v15, -inf }
  0xf5   :  { %113 = vmax.xlane.f32.xlu0 %v112_v16 }
 0x10b   :  { %194 = vrot.lane.b32.xlu0 %v760_v0, %s812_s0 }
 0x10f   :  { %464 = vrot.lane.b32.xlu0 %v760_v0, %s813_s3 }
 0x17e   :  { %v111_v17 = vpop.xlane.xlu0 %110 }
 0x17f   :  { %v115_v18 = vsub.f32 %v106_v13, %v111_v17 }
 0x181   :  { %v117_v19 = vmul.f32 1.442695, %v115_v18 }
 0x182   :  { %v114_v20 = vpop.xlane.xlu0 %113 }
 0x183   :  { %763 = vpow2.f32 %v117_v19  ;;  %v116_v21 = vsub.f32 %v107_v15, %v114_v20 }
 0x185   :  { %v119_v22 = vmul.f32 1.442695, %v116_v21 }
 0x186   :  { %v195_v40 = vpop.permute.xlu0 %194 }
 0x187   :  { %765 = vpow2.f32 %v119_v22  ;;  %v200_v44 = vsel %vm56_vm0, %v195_v40, 0 }
 0x18a   :  { %v465_v48 = vpop.permute.xlu0 %464 }
 0x18b   :  { %v470_v50 = vsel %vm56_vm0, %v465_v48, 0 }
 0x18d   :  { %v764_v23 = vpop.eup %763 }
 0x18e   :  { %v121_v24 = vsel %vm108_vm3, %v764_v23, 0.0 }
 0x18f   :  { %122 = vadd.xlane.f32.xlu1 %v121_v24 }
 0x191   :  { %v766_v25 = vpop.eup %765 }
 0x192   :  { %v124_v26 = vsel %vm108_vm3, %v766_v25, 0.0 }
 0x193   :  { %125 = vadd.xlane.f32.xlu1 %v124_v26 }
 0x1a4   :  { %192 = vrot.lane.b32.xlu1 %v761_v3, %s812_s0 }
 0x1a8   :  { %329 = vrot.lane.b32.xlu1 %v760_v0, %s814_s27 }
 0x1ac   :  { %327 = vrot.lane.b32.xlu1 %v761_v3, %s814_s27 }
 0x1b0   :  { %462 = vrot.lane.b32.xlu1 %v761_v3, %s813_s3 }
 0x21c   :  { %v123_v28 = vpop.xlane.xlu1 %122 }
 0x21d   :  { %767 = vrcp.f32 %v123_v28 }
 0x220   :  { %v126_v29 = vpop.xlane.xlu1 %125 }
 0x221   :  { %769 = vrcp.f32 %v126_v29 }
 0x224   :  { %v193_v43 = vpop.permute.xlu1 %192 }
 0x227   :  { %v768_v31 = vpop.eup %767 }
 0x228   :  { %v132_v32 = vmul.f32 %v768_v31, %v131_v30  ;;  %v330_v46 = vpop.permute.xlu1 %329 }
 0x229   :  { %v335_v47 = vsel %vm56_vm0, %v330_v46, 0 }
 0x22a   :  { %v134_v36 = vmul.f32 %v764_v23, %v132_v32 }
 0x22b   :  { %v770_v34 = vpop.eup %769 }
 0x22c   :  { %v133_v35 = vmul.f32 %v770_v34, %v131_v30  ;;  %v139_v41 = vadd.f32 %v137_v37, %v134_v36  ;;  %v328_v49 = vpop.permute.xlu1 %327 }
 0x22e   :  { %v135_v39 = vmul.f32 %v766_v25, %v133_v35 }
 0x230   :  { %v140_v42 = vadd.f32 %v138_v38, %v135_v39  ;;  %v463_v51 = vpop.permute.xlu1 %462 }
 0x232   :  { %v141_v45 = vpack.c.bf16 %v140_v42, %v139_v41 }
 0x234   :  { %700 = vmatmul.mubr.msk.bf16.vlgmr.msra.gmra.mrb[0].mxu1 %vm108_vm3, %v141_v45 }
 0x235   :  { %704 = vmatpush3.bf16.xpose.msra.mxu1 %v200_v44  ;;  %705 = vmatprep.mubr.msk.bf16.mxu1 %vm811_vm1, %v810_v1 }
 0x236   :  { %715 = vmatprep.subr.bf16.mxu1 %v810_v1 }
 0x23c   :  { %706 = vmatmul.mubr.msk.bf16.vlgmr.msra.gmra.mrb[4].mxu1 %vm56_vm0, %v193_v43 }
 0x23d   :  { %716 = vmatpush3.bf16.xpose.msra.mxu1 %v335_v47  ;;  %717 = vmatprep.mubr.msk.bf16.mxu1 %vm811_vm1, %v810_v1 }
 0x23e   :  { %727 = vmatprep.subr.bf16.mxu1 %v810_v1 }
 0x244   :  { %718 = vmatmul.mubr.msk.bf16.vlgmr.msra.gmra.mrb[8].mxu1 %vm56_vm0, %v328_v49 }
 0x245   :  { %728 = vmatpush3.bf16.xpose.msra.mxu1 %v470_v50  ;;  %729 = vmatprep.mubr.msk.bf16.mxu1 %vm811_vm1, %v810_v1 }
 0x24c   :  { %730 = vmatmul.mubr.msk.bf16.vlgmr.msra.gmra.mrb[12].mxu1 %vm56_vm0, %v463_v51 }
 0x307   :  { %v912_v52 = vpop.f32.mrb[0].mxu1 }
 0x308   :  { %v701_v53 = vpop.f32.mrb[1].mxu1 }
 0x309   :  { %v914_v54 = vpop.f32.mrb[2].mxu1 }
 0x30a   :  { %v702_v55 = vpop.f32.mrb[3].mxu1 }
 0x30f   :  { %v236_v56 = vpop.f32.mrb[4].mxu1 }
 0x310   :  { %v243_v57 = vmul.f32 0.17677669, %v236_v56  ;;  %v707_v58 = vpop.f32.mrb[5].mxu1 }
 0x311   :  { %v239_v59 = vpop.f32.mrb[6].mxu1 }
 0x312   :  { %v244_v60 = vmul.f32 0.17677669, %v239_v59  ;;  %v708_v61 = vpop.f32.mrb[7].mxu1  ;;  %v245_v62 = vsel %vm38_vm2, -1e+30, %v243_v57 }
 0x313   :  { %v247_v63 = vsel %vm108_vm3, %v245_v62, -inf  ;;  %v269_v61 = vstv %s651_s2 }
 0x314   :  { %248 = vmax.xlane.f32.xlu0 %v247_v63  ;;  %v246_v0 = vsel %vm39_vm4, -1e+30, %v244_v60 }
 0x315   :  { %v250_v2 = vsel %vm108_vm3, %v246_v0, -inf }
 0x316   :  { %251 = vmax.xlane.f32.xlu1 %v250_v2 }
 0x317   :  { %v371_v3 = vpop.f32.mrb[8].mxu1 }
 0x318   :  { %v378_v4 = vmul.f32 0.17677669, %v371_v3  ;;  %v719_v7 = vpop.f32.mrb[9].mxu1  ;;  %v274_v3 = vstv %s652_s7 }
 0x319   :  { %v374_v8 = vpop.f32.mrb[10].mxu1 }
 0x31a   :  { %v379_v9 = vmul.f32 0.17677669, %v374_v8  ;;  %v720_v10 = vpop.f32.mrb[11].mxu1  ;;  %v380_v11 = vsel %vm38_vm2, -1e+30, %v378_v4 }
 0x31b   :  { %v382_v12 = vsel %vm108_vm3, %v380_v11, -inf  ;;  %v275_v10 = vmul.f32 %v868_v5, %v274_v3 }
 0x31c   :  { %383 = vmax.xlane.f32.xlu0 %v382_v12  ;;  %v381_v13 = vsel %vm39_vm4, -1e+30, %v379_v9 }
 0x31d   :  { %v385_v15 = vsel %vm108_vm3, %v381_v13, -inf }
 0x31f   :  { %v506_v14 = vpop.f32.mrb[12].mxu1 }
 0x320   :  { %v513_v16 = vmul.f32 0.17677669, %v506_v14  ;;  %386 = vmax.xlane.f32.xlu0 %v385_v15  ;;  %v731_v17 = vpop.f32.mrb[13].mxu1 }
 0x321   :  { %v509_v18 = vpop.f32.mrb[14].mxu1  ;;  %v409_v17 = vstv %s656_s9 }
 0x322   :  { %v514_v19 = vmul.f32 0.17677669, %v509_v18  ;;  %v515_v20 = vsel %vm38_vm2, -1e+30, %v513_v16  ;;  %v732_v21 = vpop.f32.mrb[15].mxu1 }
 0x323   :  { %v517_v22 = vsel %vm108_vm3, %v515_v20, -inf }
 0x324   :  { %518 = vmax.xlane.f32.xlu0 %v517_v22  ;;  %v516_v23 = vsel %vm39_vm4, -1e+30, %v514_v19 }
 0x325   :  { %v520_v24 = vsel %vm108_vm3, %v516_v23, -inf }
 0x326   :  { %521 = vmax.xlane.f32.xlu1 %v520_v24  ;;  %v411_v24 = vmul.f32 %v870_v6, %v409_v17 }
 0x3a1   :  { %v249_v25 = vpop.xlane.xlu0 %248 }
 0x3a2   :  { %v253_v26 = vsub.f32 %v245_v62, %v249_v25 }
 0x3a3   :  { %v252_v28 = vpop.xlane.xlu1 %251 }
 0x3a4   :  { %v255_v29 = vmul.f32 1.442695, %v253_v26  ;;  %v254_v30 = vsub.f32 %v246_v0, %v252_v28 }
 0x3a6   :  { %771 = vpow2.f32 %v255_v29  ;;  %v257_v31 = vmul.f32 1.442695, %v254_v30 }
 0x3a8   :  { %773 = vpow2.f32 %v257_v31 }
 0x3a9   :  { %v384_v32 = vpop.xlane.xlu0 %383 }
 0x3aa   :  { %v388_v33 = vsub.f32 %v380_v11, %v384_v32  ;;  %v404_v11 = vstv %s655_s8 }
 0x3ac   :  { %v390_v34 = vmul.f32 1.442695, %v388_v33  ;;  %v539_v33 = vstv %s659_s10 }
 0x3ad   :  { %v387_v35 = vpop.xlane.xlu0 %386 }
 0x3ae   :  { %775 = vpow2.f32 %v390_v34  ;;  %v389_v36 = vsub.f32 %v381_v13, %v387_v35  ;;  %v544_v35 = vstv %s660_s11 }
 0x3b0   :  { %v772_v37 = vpop.eup %771  ;;  %v392_v38 = vmul.f32 1.442695, %v389_v36 }
 0x3b1   :  { %v519_v39 = vpop.xlane.xlu0 %518  ;;  %v259_v40 = vsel %vm108_vm3, %v772_v37, 0.0 }
 0x3b2   :  { %v774_v41 = vpop.eup %773  ;;  %777 = vpow2.f32 %v392_v38  ;;  %v523_v42 = vsub.f32 %v515_v20, %v519_v39  ;;  %260 = vadd.xlane.f32.xlu0 %v259_v40  ;;  %v545_v39 = vmul.f32 %v868_v5, %v544_v35  ;;  %v546_v40 = vmul.f32 %v870_v6, %v544_v35 }
 0x3b3   :  { %v262_v43 = vsel %vm108_vm3, %v774_v41, 0.0  ;;  %v522_v51 = vpop.xlane.xlu1 %521 }
 0x3b4   :  { %v525_v44 = vmul.f32 1.442695, %v523_v42  ;;  %263 = vadd.xlane.f32.xlu1 %v262_v43  ;;  %v524_v53 = vsub.f32 %v516_v23, %v522_v51  ;;  %v410_v23 = vmul.f32 %v868_v5, %v409_v17 }
 0x3b6   :  { %779 = vpow2.f32 %v525_v44  ;;  %v527_v55 = vmul.f32 1.442695, %v524_v53 }
 0x3b8   :  { %v776_v45 = vpop.eup %775  ;;  %781 = vpow2.f32 %v527_v55 }
 0x3b9   :  { %v394_v46 = vsel %vm108_vm3, %v776_v45, 0.0 }
 0x3ba   :  { %395 = vadd.xlane.f32.xlu0 %v394_v46 }
 0x3bc   :  { %v778_v47 = vpop.eup %777 }
 0x3bd   :  { %v397_v48 = vsel %vm108_vm3, %v778_v47, 0.0 }
 0x3be   :  { %398 = vadd.xlane.f32.xlu1 %v397_v48 }
 0x3c0   :  { %v938_v49 = vpop.eup %779 }
 0x3c1   :  { %v529_v50 = vsel %vm108_vm3, %v938_v49, 0.0 }
 0x3c2   :  { %530 = vadd.xlane.f32.xlu0 %v529_v50  ;;  %v946_v56 = vpop.eup %781 }
 0x3c3   :  { %v532_v57 = vsel %vm108_vm3, %v946_v56, 0.0 }
 0x3cf   :  { %415 = vrot.lane.b32.xlu1 %v889_v27, %s814_s27 }
 0x3d8   :  { %280 = vrot.lane.b32.xlu0 %v889_v27, %s812_s0 }
 0x3f3   :  { %533 = vadd.xlane.f32.xlu1 %v532_v57 }
 0x404   :  { %550 = vrot.lane.b32.xlu1 %v889_v27, %s813_s3  ;;  %v276_v27 = vmul.f32 %v870_v6, %v274_v3 }
 0x43f   :  { %v261_v58 = vpop.xlane.xlu0 %260 }
 0x440   :  { %783 = vrcp.f32 %v261_v58 }
 0x441   :  { %v264_v59 = vpop.xlane.xlu1 %263 }
 0x442   :  { %785 = vrcp.f32 %v264_v59 }
 0x447   :  { %v396_v60 = vpop.xlane.xlu0 %395 }
 0x448   :  { %787 = vrcp.f32 %v396_v60 }
 0x44a   :  { %v784_v62 = vpop.eup %783 }
 0x44b   :  { %v270_v63 = vmul.f32 %v784_v62, %v269_v61  ;;  %v399_v0 = vpop.xlane.xlu1 %398 }
 0x44c   :  { %v786_v2 = vpop.eup %785  ;;  %789 = vrcp.f32 %v399_v0 }
 0x44d   :  { %v271_v4 = vmul.f32 %v786_v2, %v269_v61  ;;  %v272_v7 = vmul.f32 %v772_v37, %v270_v63 }
 0x44f   :  { %v273_v8 = vmul.f32 %v774_v41, %v271_v4  ;;  %v531_v9 = vpop.xlane.xlu0 %530  ;;  %v277_v16 = vadd.f32 %v275_v10, %v272_v7  ;;  %v416_v22 = vpop.permute.xlu1 %415 }
 0x450   :  { %791 = vrcp.f32 %v531_v9 }
 0x451   :  { %v278_v12 = vadd.f32 %v276_v27, %v273_v8 }
 0x452   :  { %v788_v13 = vpop.eup %787 }
 0x453   :  { %v405_v14 = vmul.f32 %v788_v13, %v404_v11  ;;  %v281_v15 = vpop.permute.xlu0 %280  ;;  %v279_v18 = vpack.c.bf16 %v278_v12, %v277_v16 }
 0x454   :  { %710 = vmatpush3.bf16.msra.mxu0 %v281_v15 }
 0x455   :  { %721 = vmatprep.subr.bf16.mxu0 %v810_v1  ;;  %v407_v20 = vmul.f32 %v776_v45, %v405_v14 }
 0x456   :  { %v790_v19 = vpop.eup %789 }
 0x457   :  { %v406_v21 = vmul.f32 %v790_v19, %v404_v11  ;;  %712 = vmatmul.mubr.msk.bf16.vlgmr.msra.gmra.mrb[4].mxu0 %vm108_vm3, %v279_v18  ;;  %v412_v26 = vadd.f32 %v410_v23, %v407_v20 }
 0x458   :  { %722 = vmatpush3.bf16.msra.mxu0 %v416_v22  ;;  %723 = vmatprep.mubr.msk.bf16.mxu0 %vm811_vm1, %v810_v1 }
 0x459   :  { %v408_v25 = vmul.f32 %v778_v47, %v406_v21  ;;  %733 = vmatprep.subr.bf16.mxu0 %v810_v1 }
 0x45a   :  { %v792_v32 = vpop.eup %791 }
 0x45b   :  { %v413_v28 = vadd.f32 %v411_v24, %v408_v25  ;;  %v540_v34 = vmul.f32 %v792_v32, %v539_v33 }
 0x45d   :  { %v414_v29 = vpack.c.bf16 %v413_v28, %v412_v26  ;;  %v542_v37 = vmul.f32 %v938_v49, %v540_v34 }
 0x45f   :  { %724 = vmatmul.mubr.msk.bf16.vlgmr.msra.gmra.mrb[8].mxu0 %vm108_vm3, %v414_v29  ;;  %v547_v41 = vadd.f32 %v545_v39, %v542_v37 }
 0x460   :  { %735 = vmatprep.mubr.msk.bf16.mxu0 %vm811_vm1, %v810_v1 }
 0x480   :  { %v534_v30 = vpop.xlane.xlu1 %533 }
 0x481   :  { %793 = vrcp.f32 %v534_v30 }
 0x484   :  { %v551_v31 = vpop.permute.xlu1 %550 }
 0x485   :  { %734 = vmatpush3.bf16.msra.mxu0 %v551_v31 }
 0x48b   :  { %v794_v36 = vpop.eup %793 }
 0x48c   :  { %v541_v38 = vmul.f32 %v794_v36, %v539_v33 }
 0x48e   :  { %v543_v1 = vmul.f32 %v946_v56, %v541_v38 }
 0x490   :  { %v548_v42 = vadd.f32 %v546_v40, %v543_v1 }
 0x492   :  { %v549_v43 = vpack.c.bf16 %v548_v42, %v547_v41 }
 0x494   :  { %736 = vmatmul.mubr.msk.bf16.vlgmr.msra.gmra.mrb[12].mxu0 %vm108_vm3, %v549_v43 }
 0x52a   :  { %v320_v44 = vpop.f32.mrb[4].mxu0 }
 0x52b   :  { %v713_v45 = vpop.f32.mrb[5].mxu0 }
 0x52c   :  { %v323_v46 = vpop.f32.mrb[6].mxu0 }
 0x52d   :  { %v745_v47 = vpack.i.bf16 %v323_v46, %v320_v44  ;;  %v714_v48 = vpop.f32.mrb[7].mxu0 }
 0x52f   :  { %746 = vrot.lane.b32.xlu1 %v745_v47, %s813_s3 }
 0x532   :  { %v455_v49 = vpop.f32.mrb[8].mxu0 }
 0x533   :  { %v725_v50 = vpop.f32.mrb[9].mxu0 }
 0x534   :  { %v458_v51 = vpop.f32.mrb[10].mxu0 }
 0x535   :  { %v750_v5 = vpack.i.bf16 %v458_v51, %v455_v49  ;;  %v726_v53 = vpop.f32.mrb[11].mxu0 }
 0x537   :  { %751 = vrot.lane.b32.xlu0 %v750_v5, %s814_s27 }
 0x567   :  { %v590_v6 = vpop.f32.mrb[12].mxu0 }
 0x568   :  { %v737_v55 = vpop.f32.mrb[13].mxu0 }
 0x569   :  { %v593_v56 = vpop.f32.mrb[14].mxu0 }
 0x56a   :  { %v755_v57 = vpack.i.bf16 %v593_v56, %v590_v6  ;;  %v738_v58 = vpop.f32.mrb[15].mxu0 }
 0x56c   :  { %756 = vrot.lane.b32.xlu1 %v755_v57, %s812_s0 }
 0x5a1   :  { %v747_v59 = vpop.permute.xlu1 %746 }
 0x5a2   :  { %v749_v61 = vunpack.i.h.bf16 %v747_v59  ;;  %v748_v62 = vunpack.i.l.bf16 %v747_v59 }
 0x5a4   :  { %v622_v3 = vsel %vm56_vm0, %v914_v54, %v749_v61  ;;  %v621_v4 = vsel %vm56_vm0, %v912_v52, %v748_v62 }
 0x5a9   :  { %v752_v60 = vpop.permute.xlu0 %751 }
 0x5aa   :  { %v754_v63 = vunpack.i.h.bf16 %v752_v60  ;;  %v753_v0 = vunpack.i.l.bf16 %v752_v60 }
 0x5ac   :  { %v625_v8 = vsel %vm623_vm5, %v622_v3, %v754_v63  ;;  %v624_v9 = vsel %vm623_vm5, %v621_v4, %v753_v0 }
 0x5de   :  { %v757_v2 = vpop.permute.xlu1 %756 }
 0x5df   :  { %v759_v27 = vunpack.i.h.bf16 %v757_v2  ;;  %v758_v7 = vunpack.i.l.bf16 %v757_v2 }
 0x5e1   :  { %v628_v10 = vsel %vm626_vm6, %v625_v8, %v759_v27  ;;  %v627_v11 = vsel %vm626_vm6, %v624_v9, %v758_v7 }
 0x5e2   :  { %v673_v12 = vpack.c.bf16 %v628_v10, %v627_v11 }
 0x5e4   :  { %674 = vst [vmem:[%s984_s5] sm:$0xff] %v673_v12  }
 0x5e5   :  { %643 = vsyncpa [#allocation3], 1 }

</bundles_post_ra>
